<compile_context>
chip_gen: v7x
topology: tpu7x:2x2x1
jax: 0.10.0
libtpu: 0.0.40
codegen_flags: <defaults>
</compile_context>

<pallas_src>
import jax
import jax.numpy as jnp
from jax.experimental import pallas as pl
from jax.experimental.pallas import tpu as pltpu


# --------------------------------------------------------------------------
# Single fused kernel: input projection + serial recurrence + deferred h.
#   x_ref:     (T*B, E)   time-major flattened inputs
#   wx_ref:    (E, 4H)    fused input->gate weights   (gate order f,i,c,o)
#   b_ref:     (1, 4H)    fused gate biases
#   wc_ref:    (H, 4H)    fused cell->gate weights
#   allh_ref:  (T*B, H)   all hidden states (single dense store at the end)
#   c_out/h_out: (B, H)   final states, written once
#   gates_ref: (T*B, 4H)  VMEM scratch: x-projection, overwritten in place
#                         with the per-step gate pre-activations
#   c_stash_ref: (T*B, H) VMEM scratch: c_t for every step
# --------------------------------------------------------------------------
def lstm_kernel(x_ref, wx_ref, b_ref, wc_ref,
                allh_ref, c_out_ref, h_out_ref,
                gates_ref, c_stash_ref):
    TB, _ = x_ref.shape
    B, H = c_out_ref.shape
    T = TB // B                      # static Python ints

    # ---- fused input projection: one big MXU matmul, off the serial chain.
    gates_ref[...] = (
        jnp.dot(x_ref[...], wx_ref[...], preferred_element_type=jnp.float32)
        + b_ref[...]
    )

    wc = wc_ref[...]                 # (H, 4H), hoisted, reused every step

    # ---- serial recurrence.  T is tiny here, so a statically-unrolled loop
    # with static slab offsets (dense loads/stores, no dynamic-offset
    # relayouts).  For production T use the chunked-grid plan above.
    c_prev = jnp.zeros((B, H), jnp.float32)
    for t in range(T):
        r0, r1 = t * B, (t + 1) * B
        # fused gate pre-activations: one small MXU matmul + lane-dense add
        g = gates_ref[r0:r1, :] + jnp.dot(
            c_prev, wc, preferred_element_type=jnp.float32)
        # Overwrite the just-consumed slab with the pre-activations so the
        # o-gate can be recovered after the loop (this slab is never re-read
        # by later iterations).  Lane-dense (4H-wide) store, off the chain.
        gates_ref[r0:r1, :] = g
        # Full-vreg activations (2 EUP pushes) instead of 4 sliced ones.
        sig = jax.nn.sigmoid(g)
        th = jnp.tanh(g)
        c_now = (sig[:, 0 * H:1 * H] * c_prev                  # forget * c
                 + sig[:, 1 * H:2 * H] * th[:, 2 * H:3 * H])   # input * cand
        c_stash_ref[r0:r1, :] = c_now                          # off the chain
        c_prev = c_now
        # NOTE: h_t / tanh(c_t) / sigmoid(o_t) deliberately NOT computed here
        # -- they are off the recurrence's critical path (see final pass).

    # ---- deferred hidden states: one vectorized pass, one dense store.
    c_all = c_stash_ref[...]                              # (T*B, H)
    o_sig = jax.nn.sigmoid(gates_ref[:, 3 * H:4 * H])     # (T*B, H)
    h_all = jnp.tanh(c_all) * o_sig
    allh_ref[...] = h_all
    c_out_ref[...] = c_prev
    h_out_ref[...] = h_all[(T - 1) * B:, :]


# --------------------------------------------------------------------------
# Wrapper
# --------------------------------------------------------------------------
@jax.jit
def lstm_forward(x_emb, params):
    """x_emb: (B, T, E) float32.  params: fused weights wx_all/wc_all/b_all."""
    B, T, E = x_emb.shape
    G = params["b_all"].shape[-1]          # 4H
    H = G // 4

    # (B, T, E) -> (T, B, E) -> (T*B, E): per-timestep rows are contiguous.
    # (wrapper-side transpose/reshape is layout plumbing, not compute)
    x2d = jnp.transpose(x_emb, (1, 0, 2)).reshape(T * B, E)

    out_shapes = (
        jax.ShapeDtypeStruct((T * B, H), jnp.float32),   # all_h, time-major
        jax.ShapeDtypeStruct((B, H), jnp.float32),       # final c
        jax.ShapeDtypeStruct((B, H), jnp.float32),       # final h
    )
    allh2d, c_n, h_n = pl.pallas_call(
        lstm_kernel,
        out_shape=out_shapes,
        in_specs=[
            pl.BlockSpec((T * B, E), lambda: (0, 0)),
            pl.BlockSpec((E, G), lambda: (0, 0)),
            pl.BlockSpec((1, G), lambda: (0, 0)),
            pl.BlockSpec((H, G), lambda: (0, 0)),
        ],
        out_specs=(
            pl.BlockSpec((T * B, H), lambda: (0, 0)),
            pl.BlockSpec((B, H), lambda: (0, 0)),
            pl.BlockSpec((B, H), lambda: (0, 0)),
        ),
        scratch_shapes=[
            pltpu.VMEM((T * B, G), jnp.float32),   # x-proj / gate stash
            pltpu.VMEM((T * B, H), jnp.float32),   # c stash
        ],
    )(x2d, params["wx_all"], params["b_all"], params["wc_all"])

    all_h = allh2d.reshape(T, B, H).transpose(1, 0, 2)   # back to (B, T, H)
    return all_h, (c_n, h_n)


# --------------------------------------------------------------------------
# Params: mimic nn.Linear init, split W (H, E+H) into Wx (E,H) / Wc (H,H),
# then fuse the four gates (order f, i, c, o) along the output dim.
# --------------------------------------------------------------------------
def init_params(key, embedding_num, hidden_num):
    E, H = embedding_num, hidden_num
    bound = 1.0 / jnp.sqrt(E + H)
    keys = jax.random.split(key, 8)
    per_gate = {}
    wx_list, wc_list, b_list = [], [], []
    for gate, (kw, kb) in zip("fico", zip(keys[0::2], keys[1::2])):
        # PyTorch nn.Linear weight is (out=H, in=E+H); output = x @ W.T + b.
        w = jax.random.uniform(kw, (H, E + H), jnp.float32, -bound, bound)
        b = jax.random.uniform(kb, (H,), jnp.float32, -bound, bound)
        wt = w.T                                   # (E+H, H)
        per_gate[f"wx{gate}"] = wt[:E, :]
        per_gate[f"wc{gate}"] = wt[E:, :]
        per_gate[f"b{gate}"] = b.reshape(1, H)
        wx_list.append(wt[:E, :])
        wc_list.append(wt[E:, :])
        b_list.append(b.reshape(1, H))
    fused = {
        "wx_all": jnp.concatenate(wx_list, axis=1),    # (E, 4H)
        "wc_all": jnp.concatenate(wc_list, axis=1),    # (H, 4H)
        "b_all": jnp.concatenate(b_list, axis=1),      # (1, 4H)
    }
    return fused, per_gate


def lstm_reference(x_emb, per_gate):
    """Pure-JAX reference matching the PyTorch forward exactly."""
    B, T, E = x_emb.shape
    H = per_gate["bf"].shape[-1]
    c = jnp.zeros((B, H), jnp.float32)
    h = jnp.zeros((B, H), jnp.float32)
    hs = []
    for i in range(T):
        x = x_emb[:, i]
        lin = lambda g: (x @ per_gate[f"wx{g}"] + c @ per_gate[f"wc{g}"]
                         + per_gate[f"b{g}"])
        f_ = jax.nn.sigmoid(lin("f"))
        i_ = jax.nn.sigmoid(lin("i"))
        c_ = jnp.tanh(lin("c"))
        o_ = jax.nn.sigmoid(lin("o"))
        c = f_ * c + i_ * c_
        h = jnp.tanh(c) * o_
        hs.append(h)
    return jnp.stack(hs, axis=1), (c, h)


if __name__ == "__main__":
    batch, seq, embedding_num, hidden_num = 2, 8, 16, 32

    key = jax.random.PRNGKey(0)
    k_x, k_p = jax.random.split(key)
    x_emb = jax.random.normal(k_x, (batch, seq, embedding_num), jnp.float32)
    fused, per_gate = init_params(k_p, embedding_num, hidden_num)

    all_h, (c_n, h_n) = lstm_forward(x_emb, fused)
    jax.block_until_ready((all_h, c_n, h_n))

    ref_all_h, (ref_c, ref_h) = lstm_reference(x_emb, per_gate)
    assert jnp.allclose(all_h, ref_all_h, atol=1e-5, rtol=1e-5)
    assert jnp.allclose(c_n, ref_c, atol=1e-5, rtol=1e-5)
    assert jnp.allclose(h_n, ref_h, atol=1e-5, rtol=1e-5)

    print("KERNEL_OK")
</pallas_src>

<mosaic_0001>
module attributes {stable_mosaic.version = 11 : i64} {
  func.func @lstm_kernel(%arg0: memref<16x16xf32, #tpu.memory_space<vmem>>, %arg1: memref<16x128xf32, #tpu.memory_space<vmem>>, %arg2: memref<1x128xf32, #tpu.memory_space<vmem>>, %arg3: memref<32x128xf32, #tpu.memory_space<vmem>>, %arg4: memref<16x32xf32, #tpu.memory_space<vmem>>, %arg5: memref<2x32xf32, #tpu.memory_space<vmem>>, %arg6: memref<2x32xf32, #tpu.memory_space<vmem>>, %arg7: memref<16x128xf32, #tpu.memory_space<vmem>>, %arg8: memref<16x32xf32, #tpu.memory_space<vmem>>) attributes {dimension_semantics = [], scalar_prefetch = 0 : i64, scratch_operands = 2 : i64, tpu.core_type = #tpu.core_type<tc>} {
    %c0 = arith.constant 0 : index
    %c0_0 = arith.constant 0 : index
    %0 = vector.load %arg0[%c0, %c0_0] : memref<16x16xf32, #tpu.memory_space<vmem>>, vector<16x16xf32>
    %c0_1 = arith.constant 0 : index
    %c0_2 = arith.constant 0 : index
    %1 = vector.load %arg1[%c0_1, %c0_2] : memref<16x128xf32, #tpu.memory_space<vmem>>, vector<16x128xf32>
    %cst = arith.constant dense<0.000000e+00> : vector<16x128xf32>
    %2 = tpu.matmul %0, %1, %cst {dimension_numbers = #tpu.dot_dimension_numbers<[1], [0], [0], [1], [0, 0, 1, 1], [], []>} : vector<16x16xf32>, vector<16x128xf32>, vector<16x128xf32> -> vector<16x128xf32>
    %c0_3 = arith.constant 0 : index
    %c0_4 = arith.constant 0 : index
    %3 = vector.load %arg2[%c0_3, %c0_4] : memref<1x128xf32, #tpu.memory_space<vmem>>, vector<1x128xf32>
    %4 = vector.broadcast %3 : vector<1x128xf32> to vector<16x128xf32>
    %5 = arith.addf %2, %4 : vector<16x128xf32>
    %c0_5 = arith.constant 0 : index
    %c0_6 = arith.constant 0 : index
    %6 = vector.load %arg7[%c0_5, %c0_6] : memref<16x128xf32, #tpu.memory_space<vmem>>, vector<16x128xf32>
    tpu.vector_store %arg7[%c0_5, %c0_6], %5 {strides = array<i32>} : memref<16x128xf32, #tpu.memory_space<vmem>>, vector<16x128xf32>,
    %c0_7 = arith.constant 0 : index
    %c0_8 = arith.constant 0 : index
    %7 = vector.load %arg3[%c0_7, %c0_8] : memref<32x128xf32, #tpu.memory_space<vmem>>, vector<32x128xf32>
    %cst_9 = arith.constant 0.000000e+00 : f32
    %8 = vector.broadcast %cst_9 : f32 to vector<2x32xf32>
    %c0_10 = arith.constant 0 : index
    %c0_11 = arith.constant 0 : index
    %9 = vector.load %arg7[%c0_10, %c0_11] : memref<16x128xf32, #tpu.memory_space<vmem>>, vector<2x128xf32>
    %cst_12 = arith.constant dense<0.000000e+00> : vector<2x128xf32>
    %10 = tpu.matmul %8, %7, %cst_12 {dimension_numbers = #tpu.dot_dimension_numbers<[1], [0], [0], [1], [0, 0, 1, 1], [], []>} : vector<2x32xf32>, vector<32x128xf32>, vector<2x128xf32> -> vector<2x128xf32>
    %11 = arith.addf %9, %10 : vector<2x128xf32>
    %c0_13 = arith.constant 0 : index
    %c0_14 = arith.constant 0 : index
    %12 = vector.load %arg7[%c0_13, %c0_14] : memref<16x128xf32, #tpu.memory_space<vmem>>, vector<2x128xf32>
    tpu.vector_store %arg7[%c0_13, %c0_14], %11 {strides = array<i32>} : memref<16x128xf32, #tpu.memory_space<vmem>>, vector<2x128xf32>,
    %13 = arith.negf %11 : vector<2x128xf32>
    %14 = math.exp %13 : vector<2x128xf32>
    %cst_15 = arith.constant 1.000000e+00 : f32
    %15 = vector.broadcast %cst_15 : f32 to vector<2x128xf32>
    %16 = arith.addf %15, %14 : vector<2x128xf32>
    %17 = arith.divf %15, %16 : vector<2x128xf32>
    %18 = math.tanh %11 : vector<2x128xf32>
    %19 = vector.extract_strided_slice %17 {offsets = [0, 0], sizes = [2, 32], strides = [1, 1]} : vector<2x128xf32> to vector<2x32xf32>
    %20 = arith.mulf %19, %8 : vector<2x32xf32>
    %21 = vector.extract_strided_slice %17 {offsets = [0, 32], sizes = [2, 32], strides = [1, 1]} : vector<2x128xf32> to vector<2x32xf32>
    %22 = vector.extract_strided_slice %18 {offsets = [0, 64], sizes = [2, 32], strides = [1, 1]} : vector<2x128xf32> to vector<2x32xf32>
    %23 = arith.mulf %21, %22 : vector<2x32xf32>
    %24 = arith.addf %20, %23 : vector<2x32xf32>
    %c0_16 = arith.constant 0 : index
    %c0_17 = arith.constant 0 : index
    %25 = vector.load %arg8[%c0_16, %c0_17] : memref<16x32xf32, #tpu.memory_space<vmem>>, vector<2x32xf32>
    tpu.vector_store %arg8[%c0_16, %c0_17], %24 {strides = array<i32>} : memref<16x32xf32, #tpu.memory_space<vmem>>, vector<2x32xf32>,
    %c2 = arith.constant 2 : index
    %c0_18 = arith.constant 0 : index
    %26 = vector.load %arg7[%c2, %c0_18] : memref<16x128xf32, #tpu.memory_space<vmem>>, vector<2x128xf32>
    %cst_19 = arith.constant dense<0.000000e+00> : vector<2x128xf32>
    %27 = tpu.matmul %24, %7, %cst_19 {dimension_numbers = #tpu.dot_dimension_numbers<[1], [0], [0], [1], [0, 0, 1, 1], [], []>} : vector<2x32xf32>, vector<32x128xf32>, vector<2x128xf32> -> vector<2x128xf32>
    %28 = arith.addf %26, %27 : vector<2x128xf32>
    %c2_20 = arith.constant 2 : index
    %c0_21 = arith.constant 0 : index
    %29 = vector.load %arg7[%c2_20, %c0_21] : memref<16x128xf32, #tpu.memory_space<vmem>>, vector<2x128xf32>
    tpu.vector_store %arg7[%c2_20, %c0_21], %28 {strides = array<i32>} : memref<16x128xf32, #tpu.memory_space<vmem>>, vector<2x128xf32>,
    %30 = arith.negf %28 : vector<2x128xf32>
    %31 = math.exp %30 : vector<2x128xf32>
    %cst_22 = arith.constant 1.000000e+00 : f32
    %32 = vector.broadcast %cst_22 : f32 to vector<2x128xf32>
    %33 = arith.addf %32, %31 : vector<2x128xf32>
    %34 = arith.divf %32, %33 : vector<2x128xf32>
    %35 = math.tanh %28 : vector<2x128xf32>
    %36 = vector.extract_strided_slice %34 {offsets = [0, 0], sizes = [2, 32], strides = [1, 1]} : vector<2x128xf32> to vector<2x32xf32>
    %37 = arith.mulf %36, %24 : vector<2x32xf32>
    %38 = vector.extract_strided_slice %34 {offsets = [0, 32], sizes = [2, 32], strides = [1, 1]} : vector<2x128xf32> to vector<2x32xf32>
    %39 = vector.extract_strided_slice %35 {offsets = [0, 64], sizes = [2, 32], strides = [1, 1]} : vector<2x128xf32> to vector<2x32xf32>
    %40 = arith.mulf %38, %39 : vector<2x32xf32>
    %41 = arith.addf %37, %40 : vector<2x32xf32>
    %c2_23 = arith.constant 2 : index
    %c0_24 = arith.constant 0 : index
    %42 = vector.load %arg8[%c2_23, %c0_24] : memref<16x32xf32, #tpu.memory_space<vmem>>, vector<2x32xf32>
    tpu.vector_store %arg8[%c2_23, %c0_24], %41 {strides = array<i32>} : memref<16x32xf32, #tpu.memory_space<vmem>>, vector<2x32xf32>,
    %c4 = arith.constant 4 : index
    %c0_25 = arith.constant 0 : index
    %43 = vector.load %arg7[%c4, %c0_25] : memref<16x128xf32, #tpu.memory_space<vmem>>, vector<2x128xf32>
    %cst_26 = arith.constant dense<0.000000e+00> : vector<2x128xf32>
    %44 = tpu.matmul %41, %7, %cst_26 {dimension_numbers = #tpu.dot_dimension_numbers<[1], [0], [0], [1], [0, 0, 1, 1], [], []>} : vector<2x32xf32>, vector<32x128xf32>, vector<2x128xf32> -> vector<2x128xf32>
    %45 = arith.addf %43, %44 : vector<2x128xf32>
    %c4_27 = arith.constant 4 : index
    %c0_28 = arith.constant 0 : index
    %46 = vector.load %arg7[%c4_27, %c0_28] : memref<16x128xf32, #tpu.memory_space<vmem>>, vector<2x128xf32>
    tpu.vector_store %arg7[%c4_27, %c0_28], %45 {strides = array<i32>} : memref<16x128xf32, #tpu.memory_space<vmem>>, vector<2x128xf32>,
    %47 = arith.negf %45 : vector<2x128xf32>
    %48 = math.exp %47 : vector<2x128xf32>
    %cst_29 = arith.constant 1.000000e+00 : f32
    %49 = vector.broadcast %cst_29 : f32 to vector<2x128xf32>
    %50 = arith.addf %49, %48 : vector<2x128xf32>
    %51 = arith.divf %49, %50 : vector<2x128xf32>
    %52 = math.tanh %45 : vector<2x128xf32>
    %53 = vector.extract_strided_slice %51 {offsets = [0, 0], sizes = [2, 32], strides = [1, 1]} : vector<2x128xf32> to vector<2x32xf32>
    %54 = arith.mulf %53, %41 : vector<2x32xf32>
    %55 = vector.extract_strided_slice %51 {offsets = [0, 32], sizes = [2, 32], strides = [1, 1]} : vector<2x128xf32> to vector<2x32xf32>
    %56 = vector.extract_strided_slice %52 {offsets = [0, 64], sizes = [2, 32], strides = [1, 1]} : vector<2x128xf32> to vector<2x32xf32>
    %57 = arith.mulf %55, %56 : vector<2x32xf32>
    %58 = arith.addf %54, %57 : vector<2x32xf32>
    %c4_30 = arith.constant 4 : index
    %c0_31 = arith.constant 0 : index
    %59 = vector.load %arg8[%c4_30, %c0_31] : memref<16x32xf32, #tpu.memory_space<vmem>>, vector<2x32xf32>
    tpu.vector_store %arg8[%c4_30, %c0_31], %58 {strides = array<i32>} : memref<16x32xf32, #tpu.memory_space<vmem>>, vector<2x32xf32>,
    %c6 = arith.constant 6 : index
    %c0_32 = arith.constant 0 : index
    %60 = vector.load %arg7[%c6, %c0_32] : memref<16x128xf32, #tpu.memory_space<vmem>>, vector<2x128xf32>
    %cst_33 = arith.constant dense<0.000000e+00> : vector<2x128xf32>
    %61 = tpu.matmul %58, %7, %cst_33 {dimension_numbers = #tpu.dot_dimension_numbers<[1], [0], [0], [1], [0, 0, 1, 1], [], []>} : vector<2x32xf32>, vector<32x128xf32>, vector<2x128xf32> -> vector<2x128xf32>
    %62 = arith.addf %60, %61 : vector<2x128xf32>
    %c6_34 = arith.constant 6 : index
    %c0_35 = arith.constant 0 : index
    %63 = vector.load %arg7[%c6_34, %c0_35] : memref<16x128xf32, #tpu.memory_space<vmem>>, vector<2x128xf32>
    tpu.vector_store %arg7[%c6_34, %c0_35], %62 {strides = array<i32>} : memref<16x128xf32, #tpu.memory_space<vmem>>, vector<2x128xf32>,
    %64 = arith.negf %62 : vector<2x128xf32>
    %65 = math.exp %64 : vector<2x128xf32>
    %cst_36 = arith.constant 1.000000e+00 : f32
    %66 = vector.broadcast %cst_36 : f32 to vector<2x128xf32>
    %67 = arith.addf %66, %65 : vector<2x128xf32>
    %68 = arith.divf %66, %67 : vector<2x128xf32>
    %69 = math.tanh %62 : vector<2x128xf32>
    %70 = vector.extract_strided_slice %68 {offsets = [0, 0], sizes = [2, 32], strides = [1, 1]} : vector<2x128xf32> to vector<2x32xf32>
    %71 = arith.mulf %70, %58 : vector<2x32xf32>
    %72 = vector.extract_strided_slice %68 {offsets = [0, 32], sizes = [2, 32], strides = [1, 1]} : vector<2x128xf32> to vector<2x32xf32>
    %73 = vector.extract_strided_slice %69 {offsets = [0, 64], sizes = [2, 32], strides = [1, 1]} : vector<2x128xf32> to vector<2x32xf32>
    %74 = arith.mulf %72, %73 : vector<2x32xf32>
    %75 = arith.addf %71, %74 : vector<2x32xf32>
    %c6_37 = arith.constant 6 : index
    %c0_38 = arith.constant 0 : index
    %76 = vector.load %arg8[%c6_37, %c0_38] : memref<16x32xf32, #tpu.memory_space<vmem>>, vector<2x32xf32>
    tpu.vector_store %arg8[%c6_37, %c0_38], %75 {strides = array<i32>} : memref<16x32xf32, #tpu.memory_space<vmem>>, vector<2x32xf32>,
    %c8 = arith.constant 8 : index
    %c0_39 = arith.constant 0 : index
    %77 = vector.load %arg7[%c8, %c0_39] : memref<16x128xf32, #tpu.memory_space<vmem>>, vector<2x128xf32>
    %cst_40 = arith.constant dense<0.000000e+00> : vector<2x128xf32>
    %78 = tpu.matmul %75, %7, %cst_40 {dimension_numbers = #tpu.dot_dimension_numbers<[1], [0], [0], [1], [0, 0, 1, 1], [], []>} : vector<2x32xf32>, vector<32x128xf32>, vector<2x128xf32> -> vector<2x128xf32>
    %79 = arith.addf %77, %78 : vector<2x128xf32>
    %c8_41 = arith.constant 8 : index
    %c0_42 = arith.constant 0 : index
    %80 = vector.load %arg7[%c8_41, %c0_42] : memref<16x128xf32, #tpu.memory_space<vmem>>, vector<2x128xf32>
    tpu.vector_store %arg7[%c8_41, %c0_42], %79 {strides = array<i32>} : memref<16x128xf32, #tpu.memory_space<vmem>>, vector<2x128xf32>,
    %81 = arith.negf %79 : vector<2x128xf32>
    %82 = math.exp %81 : vector<2x128xf32>
    %cst_43 = arith.constant 1.000000e+00 : f32
    %83 = vector.broadcast %cst_43 : f32 to vector<2x128xf32>
    %84 = arith.addf %83, %82 : vector<2x128xf32>
    %85 = arith.divf %83, %84 : vector<2x128xf32>
    %86 = math.tanh %79 : vector<2x128xf32>
    %87 = vector.extract_strided_slice %85 {offsets = [0, 0], sizes = [2, 32], strides = [1, 1]} : vector<2x128xf32> to vector<2x32xf32>
    %88 = arith.mulf %87, %75 : vector<2x32xf32>
    %89 = vector.extract_strided_slice %85 {offsets = [0, 32], sizes = [2, 32], strides = [1, 1]} : vector<2x128xf32> to vector<2x32xf32>
    %90 = vector.extract_strided_slice %86 {offsets = [0, 64], sizes = [2, 32], strides = [1, 1]} : vector<2x128xf32> to vector<2x32xf32>
    %91 = arith.mulf %89, %90 : vector<2x32xf32>
    %92 = arith.addf %88, %91 : vector<2x32xf32>
    %c8_44 = arith.constant 8 : index
    %c0_45 = arith.constant 0 : index
    %93 = vector.load %arg8[%c8_44, %c0_45] : memref<16x32xf32, #tpu.memory_space<vmem>>, vector<2x32xf32>
    tpu.vector_store %arg8[%c8_44, %c0_45], %92 {strides = array<i32>} : memref<16x32xf32, #tpu.memory_space<vmem>>, vector<2x32xf32>,
    %c10 = arith.constant 10 : index
    %c0_46 = arith.constant 0 : index
    %94 = vector.load %arg7[%c10, %c0_46] : memref<16x128xf32, #tpu.memory_space<vmem>>, vector<2x128xf32>
    %cst_47 = arith.constant dense<0.000000e+00> : vector<2x128xf32>
    %95 = tpu.matmul %92, %7, %cst_47 {dimension_numbers = #tpu.dot_dimension_numbers<[1], [0], [0], [1], [0, 0, 1, 1], [], []>} : vector<2x32xf32>, vector<32x128xf32>, vector<2x128xf32> -> vector<2x128xf32>
    %96 = arith.addf %94, %95 : vector<2x128xf32>
    %c10_48 = arith.constant 10 : index
    %c0_49 = arith.constant 0 : index
    %97 = vector.load %arg7[%c10_48, %c0_49] : memref<16x128xf32, #tpu.memory_space<vmem>>, vector<2x128xf32>
    tpu.vector_store %arg7[%c10_48, %c0_49], %96 {strides = array<i32>} : memref<16x128xf32, #tpu.memory_space<vmem>>, vector<2x128xf32>,
    %98 = arith.negf %96 : vector<2x128xf32>
    %99 = math.exp %98 : vector<2x128xf32>
    %cst_50 = arith.constant 1.000000e+00 : f32
    %100 = vector.broadcast %cst_50 : f32 to vector<2x128xf32>
    %101 = arith.addf %100, %99 : vector<2x128xf32>
    %102 = arith.divf %100, %101 : vector<2x128xf32>
    %103 = math.tanh %96 : vector<2x128xf32>
    %104 = vector.extract_strided_slice %102 {offsets = [0, 0], sizes = [2, 32], strides = [1, 1]} : vector<2x128xf32> to vector<2x32xf32>
    %105 = arith.mulf %104, %92 : vector<2x32xf32>
    %106 = vector.extract_strided_slice %102 {offsets = [0, 32], sizes = [2, 32], strides = [1, 1]} : vector<2x128xf32> to vector<2x32xf32>
    %107 = vector.extract_strided_slice %103 {offsets = [0, 64], sizes = [2, 32], strides = [1, 1]} : vector<2x128xf32> to vector<2x32xf32>
    %108 = arith.mulf %106, %107 : vector<2x32xf32>
    %109 = arith.addf %105, %108 : vector<2x32xf32>
    %c10_51 = arith.constant 10 : index
    %c0_52 = arith.constant 0 : index
    %110 = vector.load %arg8[%c10_51, %c0_52] : memref<16x32xf32, #tpu.memory_space<vmem>>, vector<2x32xf32>
    tpu.vector_store %arg8[%c10_51, %c0_52], %109 {strides = array<i32>} : memref<16x32xf32, #tpu.memory_space<vmem>>, vector<2x32xf32>,
    %c12 = arith.constant 12 : index
    %c0_53 = arith.constant 0 : index
    %111 = vector.load %arg7[%c12, %c0_53] : memref<16x128xf32, #tpu.memory_space<vmem>>, vector<2x128xf32>
    %cst_54 = arith.constant dense<0.000000e+00> : vector<2x128xf32>
    %112 = tpu.matmul %109, %7, %cst_54 {dimension_numbers = #tpu.dot_dimension_numbers<[1], [0], [0], [1], [0, 0, 1, 1], [], []>} : vector<2x32xf32>, vector<32x128xf32>, vector<2x128xf32> -> vector<2x128xf32>
    %113 = arith.addf %111, %112 : vector<2x128xf32>
    %c12_55 = arith.constant 12 : index
    %c0_56 = arith.constant 0 : index
    %114 = vector.load %arg7[%c12_55, %c0_56] : memref<16x128xf32, #tpu.memory_space<vmem>>, vector<2x128xf32>
    tpu.vector_store %arg7[%c12_55, %c0_56], %113 {strides = array<i32>} : memref<16x128xf32, #tpu.memory_space<vmem>>, vector<2x128xf32>,
    %115 = arith.negf %113 : vector<2x128xf32>
    %116 = math.exp %115 : vector<2x128xf32>
    %cst_57 = arith.constant 1.000000e+00 : f32
    %117 = vector.broadcast %cst_57 : f32 to vector<2x128xf32>
    %118 = arith.addf %117, %116 : vector<2x128xf32>
    %119 = arith.divf %117, %118 : vector<2x128xf32>
    %120 = math.tanh %113 : vector<2x128xf32>
    %121 = vector.extract_strided_slice %119 {offsets = [0, 0], sizes = [2, 32], strides = [1, 1]} : vector<2x128xf32> to vector<2x32xf32>
    %122 = arith.mulf %121, %109 : vector<2x32xf32>
    %123 = vector.extract_strided_slice %119 {offsets = [0, 32], sizes = [2, 32], strides = [1, 1]} : vector<2x128xf32> to vector<2x32xf32>
    %124 = vector.extract_strided_slice %120 {offsets = [0, 64], sizes = [2, 32], strides = [1, 1]} : vector<2x128xf32> to vector<2x32xf32>
    %125 = arith.mulf %123, %124 : vector<2x32xf32>
    %126 = arith.addf %122, %125 : vector<2x32xf32>
    %c12_58 = arith.constant 12 : index
    %c0_59 = arith.constant 0 : index
    %127 = vector.load %arg8[%c12_58, %c0_59] : memref<16x32xf32, #tpu.memory_space<vmem>>, vector<2x32xf32>
    tpu.vector_store %arg8[%c12_58, %c0_59], %126 {strides = array<i32>} : memref<16x32xf32, #tpu.memory_space<vmem>>, vector<2x32xf32>,
    %c14 = arith.constant 14 : index
    %c0_60 = arith.constant 0 : index
    %128 = vector.load %arg7[%c14, %c0_60] : memref<16x128xf32, #tpu.memory_space<vmem>>, vector<2x128xf32>
    %cst_61 = arith.constant dense<0.000000e+00> : vector<2x128xf32>
    %129 = tpu.matmul %126, %7, %cst_61 {dimension_numbers = #tpu.dot_dimension_numbers<[1], [0], [0], [1], [0, 0, 1, 1], [], []>} : vector<2x32xf32>, vector<32x128xf32>, vector<2x128xf32> -> vector<2x128xf32>
    %130 = arith.addf %128, %129 : vector<2x128xf32>
    %c14_62 = arith.constant 14 : index
    %c0_63 = arith.constant 0 : index
    %131 = vector.load %arg7[%c14_62, %c0_63] : memref<16x128xf32, #tpu.memory_space<vmem>>, vector<2x128xf32>
    tpu.vector_store %arg7[%c14_62, %c0_63], %130 {strides = array<i32>} : memref<16x128xf32, #tpu.memory_space<vmem>>, vector<2x128xf32>,
    %132 = arith.negf %130 : vector<2x128xf32>
    %133 = math.exp %132 : vector<2x128xf32>
    %cst_64 = arith.constant 1.000000e+00 : f32
    %134 = vector.broadcast %cst_64 : f32 to vector<2x128xf32>
    %135 = arith.addf %134, %133 : vector<2x128xf32>
    %136 = arith.divf %134, %135 : vector<2x128xf32>
    %137 = math.tanh %130 : vector<2x128xf32>
    %138 = vector.extract_strided_slice %136 {offsets = [0, 0], sizes = [2, 32], strides = [1, 1]} : vector<2x128xf32> to vector<2x32xf32>
    %139 = arith.mulf %138, %126 : vector<2x32xf32>
    %140 = vector.extract_strided_slice %136 {offsets = [0, 32], sizes = [2, 32], strides = [1, 1]} : vector<2x128xf32> to vector<2x32xf32>
    %141 = vector.extract_strided_slice %137 {offsets = [0, 64], sizes = [2, 32], strides = [1, 1]} : vector<2x128xf32> to vector<2x32xf32>
    %142 = arith.mulf %140, %141 : vector<2x32xf32>
    %143 = arith.addf %139, %142 : vector<2x32xf32>
    %c14_65 = arith.constant 14 : index
    %c0_66 = arith.constant 0 : index
    %144 = vector.load %arg8[%c14_65, %c0_66] : memref<16x32xf32, #tpu.memory_space<vmem>>, vector<2x32xf32>
    tpu.vector_store %arg8[%c14_65, %c0_66], %143 {strides = array<i32>} : memref<16x32xf32, #tpu.memory_space<vmem>>, vector<2x32xf32>,
    %c0_67 = arith.constant 0 : index
    %c0_68 = arith.constant 0 : index
    %145 = vector.load %arg8[%c0_67, %c0_68] : memref<16x32xf32, #tpu.memory_space<vmem>>, vector<16x32xf32>
    %c0_69 = arith.constant 0 : index
    %c96 = arith.constant 96 : index
    %146 = vector.load %arg7[%c0_69, %c96] : memref<16x128xf32, #tpu.memory_space<vmem>>, vector<16x32xf32>
    %147 = arith.negf %146 : vector<16x32xf32>
    %148 = math.exp %147 : vector<16x32xf32>
    %cst_70 = arith.constant 1.000000e+00 : f32
    %149 = vector.broadcast %cst_70 : f32 to vector<16x32xf32>
    %150 = arith.addf %149, %148 : vector<16x32xf32>
    %151 = arith.divf %149, %150 : vector<16x32xf32>
    %152 = math.tanh %145 : vector<16x32xf32>
    %153 = arith.mulf %152, %151 : vector<16x32xf32>
    %c0_71 = arith.constant 0 : index
    %c0_72 = arith.constant 0 : index
    %154 = vector.load %arg4[%c0_71, %c0_72] : memref<16x32xf32, #tpu.memory_space<vmem>>, vector<16x32xf32>
    tpu.vector_store %arg4[%c0_71, %c0_72], %153 {strides = array<i32>} : memref<16x32xf32, #tpu.memory_space<vmem>>, vector<16x32xf32>,
    %c0_73 = arith.constant 0 : index
    %c0_74 = arith.constant 0 : index
    %155 = vector.load %arg5[%c0_73, %c0_74] : memref<2x32xf32, #tpu.memory_space<vmem>>, vector<2x32xf32>
    tpu.vector_store %arg5[%c0_73, %c0_74], %143 {strides = array<i32>} : memref<2x32xf32, #tpu.memory_space<vmem>>, vector<2x32xf32>,
    %156 = vector.extract_strided_slice %153 {offsets = [14, 0], sizes = [2, 32], strides = [1, 1]} : vector<16x32xf32> to vector<2x32xf32>
    %c0_75 = arith.constant 0 : index
    %c0_76 = arith.constant 0 : index
    %157 = vector.load %arg6[%c0_75, %c0_76] : memref<2x32xf32, #tpu.memory_space<vmem>>, vector<2x32xf32>
    tpu.vector_store %arg6[%c0_75, %c0_76], %156 {strides = array<i32>} : memref<2x32xf32, #tpu.memory_space<vmem>>, vector<2x32xf32>,
    return
  }
}

</mosaic_0001>

<bundles_post_ra>
// kernel: lstm_forward.1
= control target key start
LH: loop header
LB: loop body
LE: loop exit
PB: predicated region body
PF: predicated region fallthrough
CT: control target
= control target key end

     0   :  { %12 = vsyncpa [#allocation5], 0  ;;  %vm33_vm0 = vcmask 130048   ;;  %v1274_v4 = vmov 0.0|0.0   ;;  %vm1275_vm1 = vmmov 0   ;;  %v1276_v10 = vmov 0.0   ;;  %s1462_s0 = inlined_call_operand.vmem [shape: f32[16,16], index: 0, kind: input, shape index: {}]   ;;  %s1463_s1 = inlined_call_operand.vmem [shape: f32[16,128], index: 1, kind: input, shape index: {}]   ;;  %s1464_s2 = inlined_call_operand.vmem [shape: f32[1,128], index: 2, kind: input, shape index: {}]   ;;  %s1465_s3 = inlined_call_operand.vmem [shape: f32[32,128], index: 3, kind: input, shape index: {}]   ;;  %s1466_s4 = inlined_call_operand.vmem [shape: f32[16,32], index: 4, kind: output, shape index: {0}]   ;;  %s1467_s5 = inlined_call_operand.hbm [shape: f32[2,32], index: 5, kind: output, shape index: {1}]   ;;  %s1468_s6 = inlined_call_operand.hbm [shape: f32[2,32], index: 6, kind: output, shape index: {2}]  }
   0x1   :  { %v24_v0 = vld [vmem:[%s1463_s1] sm:$0xff]  ;;  %v25_v1 = vld [vmem:[%s1463_s1 + $0x8] sm:$0xff]  ;;  %1111 = vmatprep.subr.bf16.mxu1 %v1274_v4  ;;  %v119_v8 = vld [vmem:[%s1465_s3 + $0x10] sm:$0xff]  ;;  %1027 = vmatprep.mubr.msk.f32.mxu1 %vm1275_vm1, %v1276_v10 }
   0x2   :  { %v22_v2 = vld [vmem:[%s1462_s0] sm:$0xff]  ;;  %v1107_v3 = vpack.c.bf16 %v25_v1, %v24_v0  ;;  %v118_v6 = vld [vmem:[%s1465_s3 + $0x8] sm:$0xff]  ;;  %v120_v9 = vld [vmem:[%s1465_s3 + $0x18] sm:$0xff] }
   0x3   :  { %1016 = vmatprep.mubr.msk.f32.mxu0 %vm33_vm0, %v22_v2  ;;  %v117_v5 = vld [vmem:[%s1465_s3] sm:$0xff] }
   0x4   :  { %v1333_v7 = vpack.c.bf16 %v118_v6, %v117_v5 }
   0x5   :  { %13 = vsyncpa [#allocation7], 0  ;;  %1108 = vmatprep.subr.bf16.mxu0 %v1107_v3  ;;  %v23_v11 = vld [vmem:[%s1462_s0 + $0x8] sm:$0xff]  ;;  %v1347_v12 = vpack.c.bf16 %v120_v9, %v119_v8  ;;  %v948_v13 = vld [vmem:[%s1464_s2] ss:$0 sm:$0xff]  ;;  %s1277_s12 = smov 96  }
   0x6   :  { %1110 = vmatpush3.bf16.msra.mxu0 %v1107_v3  ;;  %1113 = vmatpush3.bf16.msra.mxu1 %v1333_v7  ;;  %vm216_vm2 = vcmask 254976   ;;  %vm122_vm3 = vcmask 261120   ;;  %s1278_s2 = smov 32   ;;  %s1279_s13 = smov [#allocation4]  }
   0x7   :  { %1114 = vmatprep.subr.bf16.mxu1 %v1274_v4  ;;  %1117 = vmatprep.subr.bf16.mxu0 %v1274_v4  ;;  %s924_s14 = sshll.u32 %s1279_s13, 4  ;;  %s925_s14 = int_to_ptr.vmem [resolvable:$true] %s924_s14 }
   0x8   :  { %s1226_s15 = scalar_lea.vmem %s925_s14, 32  ;;  %p1231_p1 = scmp.lt.s32.totalorder %s925_s14, %s925_s14 }
   0x9   :  { %1017 = vmatmul.mubr.msk.f32.vlgmr.msra.gmra.mrb[0].mxu0 %vm33_vm0, %v23_v11  ;;  %p1227_p0 = scmp.ne.s32.totalorder %s925_s14, %s1226_s15  ;;  %p1232_p2 = scmp.lt.s32.totalorder %s1226_s15, %s1226_s15 }
   0xa   :  { %1116 = vmatpush3.bf16.msra.mxu1 %v1347_v12  ;;  %1119 = vmatpush3.bf16.msra.mxu0 %v1333_v7 }
   0xb   :  { %1120 = vmatprep.subr.bf16.mxu0 %v1274_v4  ;;  %1038 = vmatprep.mubr.msk.f32.mxu0 %vm1275_vm1, %v1276_v10  ;;  %p1233_p3 = por %p1232_p2, %p1231_p1 }
   0xc   :  { %1123 = vmatprep.subr.bf16.mxu1 %v1274_v4 }
   0xd   :  { %1028 = vmatmul.mubr.f32.vlgmr.msra.gmra.mrb[0].mxu1 %v1276_v10  ;;  %p1234_p4 = pnand %p1233_p3, %p1227_p0 }
   0xe   :  { %1122 = vmatpush3.bf16.msra.mxu0 %v1347_v12  ;;  %1125 = vmatpush3.bf16.msra.mxu1 %v1333_v7 }
   0xf   :  { %1126 = vmatprep.subr.bf16.mxu1 %v1274_v4  ;;  %1049 = vmatprep.mubr.msk.f32.mxu1 %vm1275_vm1, %v1276_v10 }
  0x10   :  { %1129 = vmatprep.subr.bf16.mxu0 %v1274_v4 }
  0x12   :  { %1128 = vmatpush3.bf16.msra.mxu1 %v1347_v12 }
  0x13   :  { %1135 = vmatprep.subr.bf16.mxu1 %v1274_v4 }
  0xdc   :  { %v1018_v14 = vpop.f32.mrb[0].mxu0 }
  0xdd   :  { %v112_v15 = vadd.f32 %v1018_v14, %v948_v13  ;;  %v106_v16 = vpop.f32.mrb[1].mxu0 }
  0xde   :  { %v107_v17 = vadd.f32 %v948_v13, %v106_v16 }
  0xdf   :  { %116 = vst [vmem:[#allocation2 + $0x8] sm:$0xff] %v112_v15 }
  0xe0   :  { %115 = vst [vmem:[#allocation2] sm:$0xff] %v107_v17  ;;  %v192_v18 = vpop.f32.mrb[0].mxu1 }
  0xe1   :  { %v1029_v19 = vpop.f32.mrb[1].mxu1 }
  0xe6   :  { %v503_v14 = vld [vmem:[#allocation2 + $0x8] sm:$0x3] }
  0xe7   :  { %v121_v20 = vld [vmem:[#allocation2] sm:$0x3]  ;;  %v218_v32 = vld [vmem:[#allocation2 + $0x2] sm:$0x3]  ;;  %v313_v46 = vld [vmem:[#allocation2 + $0x4] sm:$0x3] }
  0xe8   :  { %v196_v21 = vadd.f32 %v192_v18, %v121_v20  ;;  %v408_v60 = vld [vmem:[#allocation2 + $0x6] sm:$0x3] }
  0xea   :  { %197 = vst [vmem:[#allocation2] sm:$0x3] %v196_v21  ;;  %1166 = vtanh.f32 %v196_v21  ;;  %v951_v23 = vmul.f32 -1.442695, %v196_v21 }
  0xec   :  { %1168 = vpow2.f32 %v951_v23 }
  0xf4   :  { %v1167_v22 = vpop.eup %1166 }
  0xf5   :  { %207 = vrot.lane.b32.xlu0 %v1167_v22, %s1277_s12 }
  0xf6   :  { %v1169_v24 = vpop.eup %1168 }
  0xf7   :  { %v201_v25 = vadd.f32 1.0, %v1169_v24 }
  0xf9   :  { %1170 = vrcp.f32 %v201_v25 }
 0x103   :  { %v1171_v26 = vpop.eup %1170 }
 0x104   :  { %v205_v29 = vmul.f32 0.0, %v1171_v26 }
 0x167   :  { %v208_v27 = vpop.permute.xlu0 %207 }
 0x168   :  { %v210_v28 = vmul.f32 %v1171_v26, %v208_v27 }
 0x16a   :  { %212 = vrot.lane.b32.xlu0 %v210_v28, %s1277_s12  ;;  %v598_v28 = vld [vmem:[#allocation2 + $0xa] sm:$0x3] }
 0x1dc   :  { %v213_v30 = vpop.permute.xlu0 %212 }
 0x1dd   :  { %v215_v31 = vadd.f32 %v213_v30, %v205_v29 }
 0x1df   :  { %217 = vst.msk [vmem:[#allocation3] sm:$0x3] %vm216_vm2, %v215_v31  ;;  %1039 = vmatmul.mubr.msk.f32.vlgmr.msra.gmra.mrb[2].mxu0 %vm122_vm3, %v215_v31 }
 0x1e0   :  { %1131 = vmatpush3.bf16.msra.mxu0 %v1333_v7  ;;  %1060 = vmatprep.mubr.msk.f32.mxu0 %vm1275_vm1, %v1276_v10 }
 0x1e1   :  { %1132 = vmatprep.subr.bf16.mxu0 %v1274_v4 }
 0x1e4   :  { %1134 = vmatpush3.bf16.msra.mxu0 %v1347_v12 }
 0x1e5   :  { %1141 = vmatprep.subr.bf16.mxu0 %v1274_v4 }
 0x2b2   :  { %v288_v33 = vpop.f32.mrb[2].mxu0 }
 0x2b3   :  { %v292_v34 = vadd.f32 %v288_v33, %v218_v32  ;;  %v1040_v35 = vpop.f32.mrb[3].mxu0 }
 0x2b5   :  { %293 = vst [vmem:[#allocation2 + $0x2] sm:$0x3] %v292_v34  ;;  %1172 = vtanh.f32 %v292_v34  ;;  %v953_v37 = vmul.f32 -1.442695, %v292_v34 }
 0x2b7   :  { %1174 = vpow2.f32 %v953_v37 }
 0x2bf   :  { %v1173_v36 = vpop.eup %1172 }
 0x2c0   :  { %303 = vrot.lane.b32.xlu1 %v1173_v36, %s1277_s12 }
 0x2c1   :  { %v1175_v38 = vpop.eup %1174 }
 0x2c2   :  { %v297_v39 = vadd.f32 1.0, %v1175_v38  ;;  %v693_v38 = vld [vmem:[#allocation2 + $0xc] sm:$0x3] }
 0x2c4   :  { %1176 = vrcp.f32 %v297_v39 }
 0x2ce   :  { %v1177_v40 = vpop.eup %1176 }
 0x2cf   :  { %v301_v43 = vmul.f32 %v1177_v40, %v215_v31 }
 0x332   :  { %v304_v41 = vpop.permute.xlu1 %303 }
 0x333   :  { %v306_v42 = vmul.f32 %v1177_v40, %v304_v41 }
 0x335   :  { %308 = vrot.lane.b32.xlu1 %v306_v42, %s1277_s12 }
 0x3a7   :  { %v309_v44 = vpop.permute.xlu1 %308 }
 0x3a8   :  { %v311_v45 = vadd.f32 %v309_v44, %v301_v43 }
 0x3aa   :  { %312 = vst.msk [vmem:[#allocation3 + $0x2] sm:$0x3] %vm216_vm2, %v311_v45  ;;  %1050 = vmatmul.mubr.msk.f32.vlgmr.msra.gmra.mrb[2].mxu1 %vm122_vm3, %v311_v45 }
 0x3ab   :  { %1137 = vmatpush3.bf16.msra.mxu1 %v1333_v7  ;;  %1071 = vmatprep.mubr.msk.f32.mxu1 %vm1275_vm1, %v1276_v10 }
 0x3ac   :  { %1138 = vmatprep.subr.bf16.mxu1 %v1274_v4 }
 0x3af   :  { %1140 = vmatpush3.bf16.msra.mxu1 %v1347_v12 }
 0x3b0   :  { %1147 = vmatprep.subr.bf16.mxu1 %v1274_v4 }
 0x47d   :  { %v383_v47 = vpop.f32.mrb[2].mxu1 }
 0x47e   :  { %v387_v48 = vadd.f32 %v383_v47, %v313_v46  ;;  %v1051_v49 = vpop.f32.mrb[3].mxu1 }
 0x480   :  { %388 = vst [vmem:[#allocation2 + $0x4] sm:$0x3] %v387_v48  ;;  %1178 = vtanh.f32 %v387_v48  ;;  %v955_v51 = vmul.f32 -1.442695, %v387_v48 }
 0x482   :  { %1180 = vpow2.f32 %v955_v51 }
 0x48a   :  { %v1179_v50 = vpop.eup %1178 }
 0x48b   :  { %398 = vrot.lane.b32.xlu0 %v1179_v50, %s1277_s12 }
 0x48c   :  { %v1181_v52 = vpop.eup %1180 }
 0x48d   :  { %v392_v53 = vadd.f32 1.0, %v1181_v52  ;;  %v788_v52 = vld [vmem:[#allocation2 + $0xe] sm:$0x3] }
 0x48f   :  { %1182 = vrcp.f32 %v392_v53 }
 0x499   :  { %v1183_v54 = vpop.eup %1182 }
 0x49a   :  { %v396_v57 = vmul.f32 %v1183_v54, %v311_v45 }
 0x4fd   :  { %v399_v55 = vpop.permute.xlu0 %398 }
 0x4fe   :  { %v401_v56 = vmul.f32 %v1183_v54, %v399_v55 }
 0x500   :  { %403 = vrot.lane.b32.xlu1 %v401_v56, %s1277_s12 }
 0x572   :  { %v404_v58 = vpop.permute.xlu1 %403 }
 0x573   :  { %v406_v59 = vadd.f32 %v404_v58, %v396_v57 }
 0x575   :  { %407 = vst.msk [vmem:[#allocation3 + $0x4] sm:$0x3] %vm216_vm2, %v406_v59  ;;  %1061 = vmatmul.mubr.msk.f32.vlgmr.msra.gmra.mrb[4].mxu0 %vm122_vm3, %v406_v59 }
 0x576   :  { %1143 = vmatpush3.bf16.msra.mxu0 %v1333_v7  ;;  %1082 = vmatprep.mubr.msk.f32.mxu0 %vm1275_vm1, %v1276_v10 }
 0x577   :  { %1144 = vmatprep.subr.bf16.mxu0 %v1274_v4 }
 0x57a   :  { %1146 = vmatpush3.bf16.msra.mxu0 %v1347_v12 }
 0x57b   :  { %1153 = vmatprep.subr.bf16.mxu0 %v1274_v4 }
 0x648   :  { %v478_v61 = vpop.f32.mrb[4].mxu0 }
 0x649   :  { %v482_v62 = vadd.f32 %v478_v61, %v408_v60  ;;  %v1062_v63 = vpop.f32.mrb[5].mxu0 }
 0x64b   :  { %483 = vst [vmem:[#allocation2 + $0x6] sm:$0x3] %v482_v62  ;;  %1184 = vtanh.f32 %v482_v62  ;;  %v957_v1 = vmul.f32 -1.442695, %v482_v62 }
 0x64d   :  { %1186 = vpow2.f32 %v957_v1 }
 0x652   :  { %v885_v63 = vld [vmem:[#allocation2] sm:$0xff] }
 0x655   :  { %v1185_v0 = vpop.eup %1184 }
 0x656   :  { %493 = vrot.lane.b32.xlu0 %v1185_v0, %s1277_s12  ;;  %v966_v0 = vmul.f32 -1.442695, %v885_v63 }
 0x657   :  { %v1187_v2 = vpop.eup %1186 }
 0x658   :  { %v487_v3 = vadd.f32 1.0, %v1187_v2 }
 0x65a   :  { %1188 = vrcp.f32 %v487_v3 }
 0x664   :  { %v1189_v5 = vpop.eup %1188 }
 0x665   :  { %v491_v9 = vmul.f32 %v1189_v5, %v406_v59 }
 0x6c8   :  { %v494_v6 = vpop.permute.xlu0 %493 }
 0x6c9   :  { %v496_v8 = vmul.f32 %v1189_v5, %v494_v6 }
 0x6cb   :  { %498 = vrot.lane.b32.xlu1 %v496_v8, %s1277_s12 }
 0x73d   :  { %v499_v11 = vpop.permute.xlu1 %498 }
 0x73e   :  { %v501_v13 = vadd.f32 %v499_v11, %v491_v9 }
 0x740   :  { %502 = vst.msk [vmem:[#allocation3 + $0x6] sm:$0x3] %vm216_vm2, %v501_v13  ;;  %1072 = vmatmul.mubr.msk.f32.vlgmr.msra.gmra.mrb[4].mxu1 %vm122_vm3, %v501_v13 }
 0x741   :  { %1149 = vmatpush3.bf16.msra.mxu1 %v1333_v7  ;;  %1093 = vmatprep.mubr.msk.f32.mxu1 %vm1275_vm1, %v1276_v10 }
 0x742   :  { %1150 = vmatprep.subr.bf16.mxu1 %v1274_v4 }
 0x745   :  { %1152 = vmatpush3.bf16.msra.mxu1 %v1347_v12 }
 0x813   :  { %v573_v15 = vpop.f32.mrb[4].mxu1 }
 0x814   :  { %v577_v16 = vadd.f32 %v573_v15, %v503_v14  ;;  %v1073_v17 = vpop.f32.mrb[5].mxu1 }
 0x816   :  { %578 = vst [vmem:[#allocation2 + $0x8] sm:$0x3] %v577_v16  ;;  %1190 = vtanh.f32 %v577_v16  ;;  %v959_v19 = vmul.f32 -1.442695, %v577_v16 }
 0x818   :  { %1192 = vpow2.f32 %v959_v19 }
 0x820   :  { %v1191_v18 = vpop.eup %1190 }
 0x821   :  { %588 = vrot.lane.b32.xlu0 %v1191_v18, %s1277_s12 }
 0x822   :  { %v1193_v20 = vpop.eup %1192 }
 0x823   :  { %v582_v21 = vadd.f32 1.0, %v1193_v20 }
 0x825   :  { %1194 = vrcp.f32 %v582_v21 }
 0x82f   :  { %v1195_v22 = vpop.eup %1194 }
 0x830   :  { %v586_v25 = vmul.f32 %v1195_v22, %v501_v13  ;;  %v883_v13 = vld [vmem:[#allocation3] sm:$0xff] }
 0x893   :  { %v589_v23 = vpop.permute.xlu0 %588 }
 0x894   :  { %v591_v24 = vmul.f32 %v1195_v22, %v589_v23 }
 0x896   :  { %593 = vrot.lane.b32.xlu1 %v591_v24, %s1277_s12 }
 0x908   :  { %v594_v26 = vpop.permute.xlu1 %593 }
 0x909   :  { %v596_v27 = vadd.f32 %v594_v26, %v586_v25 }
 0x90b   :  { %597 = vst.msk [vmem:[#allocation3 + $0x8] sm:$0x3] %vm216_vm2, %v596_v27  ;;  %1083 = vmatmul.mubr.msk.f32.vlgmr.msra.gmra.mrb[6].mxu0 %vm122_vm3, %v596_v27 }
 0x90c   :  { %1155 = vmatpush3.bf16.msra.mxu0 %v1333_v7  ;;  %1104 = vmatprep.mubr.msk.f32.mxu0 %vm1275_vm1, %v1276_v10 }
 0x90d   :  { %1156 = vmatprep.subr.bf16.mxu0 %v1274_v4 }
 0x910   :  { %1158 = vmatpush3.bf16.msra.mxu0 %v1347_v12 }
 0x9de   :  { %v668_v29 = vpop.f32.mrb[6].mxu0 }
 0x9df   :  { %v672_v30 = vadd.f32 %v668_v29, %v598_v28  ;;  %v1084_v31 = vpop.f32.mrb[7].mxu0 }
 0x9e1   :  { %673 = vst [vmem:[#allocation2 + $0xa] sm:$0x3] %v672_v30  ;;  %1196 = vtanh.f32 %v672_v30  ;;  %v961_v33 = vmul.f32 -1.442695, %v672_v30 }
 0x9e3   :  { %1198 = vpow2.f32 %v961_v33 }
 0x9eb   :  { %v1197_v32 = vpop.eup %1196 }
 0x9ec   :  { %683 = vrot.lane.b32.xlu0 %v1197_v32, %s1277_s12 }
 0x9ed   :  { %v1199_v34 = vpop.eup %1198 }
 0x9ee   :  { %v677_v7 = vadd.f32 1.0, %v1199_v34 }
 0x9f0   :  { %1200 = vrcp.f32 %v677_v7 }
 0x9fa   :  { %v1201_v35 = vpop.eup %1200 }
 0x9fb   :  { %v681_v4 = vmul.f32 %v1201_v35, %v596_v27 }
 0xa5e   :  { %v684_v10 = vpop.permute.xlu0 %683 }
 0xa5f   :  { %v686_v36 = vmul.f32 %v1201_v35, %v684_v10 }
 0xa61   :  { %688 = vrot.lane.b32.xlu1 %v686_v36, %s1277_s12 }
 0xad3   :  { %v689_v12 = vpop.permute.xlu1 %688 }
 0xad4   :  { %v691_v37 = vadd.f32 %v689_v12, %v681_v4 }
 0xad6   :  { %692 = vst.msk [vmem:[#allocation3 + $0xa] sm:$0x3] %vm216_vm2, %v691_v37  ;;  %1094 = vmatmul.mubr.msk.f32.vlgmr.msra.gmra.mrb[6].mxu1 %vm122_vm3, %v691_v37 }
 0xba9   :  { %v763_v39 = vpop.f32.mrb[6].mxu1 }
 0xbaa   :  { %v767_v40 = vadd.f32 %v763_v39, %v693_v38  ;;  %v1095_v41 = vpop.f32.mrb[7].mxu1 }
 0xbac   :  { %768 = vst [vmem:[#allocation2 + $0xc] sm:$0x3] %v767_v40  ;;  %1202 = vtanh.f32 %v767_v40  ;;  %v963_v43 = vmul.f32 -1.442695, %v767_v40 }
 0xbae   :  { %1204 = vpow2.f32 %v963_v43 }
 0xbb6   :  { %v1203_v42 = vpop.eup %1202 }
 0xbb7   :  { %778 = vrot.lane.b32.xlu0 %v1203_v42, %s1277_s12 }
 0xbb8   :  { %v1205_v44 = vpop.eup %1204 }
 0xbb9   :  { %v772_v45 = vadd.f32 1.0, %v1205_v44 }
 0xbbb   :  { %1206 = vrcp.f32 %v772_v45 }
 0xbc5   :  { %v1207_v46 = vpop.eup %1206 }
 0xbc6   :  { %v776_v49 = vmul.f32 %v1207_v46, %v691_v37 }
 0xc29   :  { %v779_v47 = vpop.permute.xlu0 %778 }
 0xc2a   :  { %v781_v48 = vmul.f32 %v1207_v46, %v779_v47 }
 0xc2c   :  { %783 = vrot.lane.b32.xlu1 %v781_v48, %s1277_s12 }
 0xc9e   :  { %v784_v50 = vpop.permute.xlu1 %783 }
 0xc9f   :  { %v786_v51 = vadd.f32 %v784_v50, %v776_v49 }
 0xca1   :  { %787 = vst.msk [vmem:[#allocation3 + $0xc] sm:$0x3] %vm216_vm2, %v786_v51  ;;  %1105 = vmatmul.mubr.msk.f32.vlgmr.msra.gmra.mrb[8].mxu0 %vm122_vm3, %v786_v51 }
 0xd74   :  { %v858_v53 = vpop.f32.mrb[8].mxu0 }
 0xd75   :  { %v862_v54 = vadd.f32 %v858_v53, %v788_v52  ;;  %v1106_v55 = vpop.f32.mrb[9].mxu0 }
 0xd77   :  { %863 = vst [vmem:[#allocation2 + $0xe] sm:$0x3] %v862_v54  ;;  %1208 = vtanh.f32 %v862_v54  ;;  %v965_v62 = vmul.f32 -1.442695, %v862_v54 }
 0xd7e   :  { %v886_v56 = vld [vmem:[#allocation2 + $0x8] sm:$0xff] }
 0xd7f   :  { %v967_v57 = vmul.f32 -1.442695, %v886_v56 }
 0xd81   :  { %v1209_v58 = vpop.eup %1208  ;;  %1210 = vpow2.f32 %v967_v57 }
 0xd82   :  { %873 = vrot.lane.b32.xlu0 %v1209_v58, %s1277_s12 }
 0xd8b   :  { %v1211_v59 = vpop.eup %1210 }
 0xd8c   :  { %v894_v60 = vadd.f32 1.0, %v1211_v59 }
 0xd8e   :  { %1212 = vrcp.f32 %v894_v60 }
 0xd8f   :  { %1214 = vpow2.f32 %v965_v62 }
 0xd90   :  { %1216 = vpow2.f32 %v966_v0 }
 0xd98   :  { %v1213_v61 = vpop.eup %1212 }
 0xd99   :  { %905 = vrot.lane.b32.xlu0 %v1213_v61, %s1278_s2  ;;  %v1215_v1 = vpop.eup %1214 }
 0xd9a   :  { %v867_v2 = vadd.f32 1.0, %v1215_v1  ;;  %v1217_v3 = vpop.eup %1216 }
 0xd9b   :  { %v893_v5 = vadd.f32 1.0, %v1217_v3 }
 0xd9c   :  { %1218 = vrcp.f32 %v867_v2 }
 0xd9d   :  { %1220 = vrcp.f32 %v893_v5 }
 0xd9e   :  { %1222 = vtanh.f32 %v883_v13 }
 0xda6   :  { %v1219_v6 = vpop.eup %1218 }
 0xda7   :  { %v1221_v11 = vpop.eup %1220  ;;  %v871_v14 = vmul.f32 %v1219_v6, %v786_v51 }
 0xda8   :  { %v1223_v17 = vpop.eup %1222 }
 0xdf4   :  { %v874_v8 = vpop.permute.xlu0 %873 }
 0xdf5   :  { %v876_v9 = vmul.f32 %v1219_v6, %v874_v8 }
 0xdf7   :  { %878 = vrot.lane.b32.xlu1 %v876_v9, %s1277_s12 }
 0xdfb   :  { %903 = vrot.lane.b32.xlu1 %v1221_v11, %s1278_s2 }
 0xe69   :  { %v879_v15 = vpop.permute.xlu1 %878 }
 0xe6a   :  { %v881_v16 = vadd.f32 %v879_v15, %v871_v14 }
 0xe6c   :  { %882 = vst.msk [vmem:[#allocation3 + $0xe] sm:$0x3] %vm216_vm2, %v881_v16  ;;  %913 = vst.msk [vmem:[#allocation4] sm:$0x3] %vm216_vm2, %v881_v16 }
 0xe6d   :  { %v904_v18 = vpop.permute.xlu1 %903 }
 0xe6e   :  { %1237 = shalt.err (!%p1234_p4)
}
 0xe6f   :  { %s1238_s18 = scalar_lea.hbm %s1467_s5, 32 }
 0xe70   :  { %p1239_p5 = scmp.ne.s32.totalorder %s1467_s5, %s1238_s18  ;;  %p1242_p6 = scmp.lt.u32.totalorder %s1238_s18, %s1467_s5 }
 0xe72   :  { %p1244_p7 = pnand %p1242_p6, %p1239_p5 }
 0xe74   :  { %1247 = shalt.err (!%p1244_p7)
}
 0xe75   :  { %927 = dma.vmem_to_hbm [thread:$0]  %s925_s14, 32, %s1467_s5, [#allocation5]   ;;  %v909_v19 = vmul.f32 %v1223_v17, %v904_v18  ;;  %v884_v20 = vld [vmem:[#allocation3 + $0x8] sm:$0xff]  ;;  %v906_v22 = vpop.permute.xlu0 %905  ;;  %vm914_vm4 = vcmask 261126  }
 0xe76   :  { %1224 = vtanh.f32 %v884_v20  ;;  %s1280_s27 = smov [#allocation6]  }
 0xe77   :  { %911 = vst.msk [vmem:[%s1466_s4] sm:$0xff] %vm122_vm3, %v909_v19  ;;  %s934_s28 = sshll.u32 %s1280_s27, 4  ;;  %s935_s28 = int_to_ptr.vmem [resolvable:$true] %s934_s28 }
 0xe78   :  { %s1248_s5 = scalar_lea.vmem %s935_s28, 32  ;;  %p1253_p9 = scmp.lt.s32.totalorder %s935_s28, %s935_s28 }
 0xe79   :  { %p1249_p8 = scmp.ne.s32.totalorder %s935_s28, %s1248_s5  ;;  %p1254_p10 = scmp.lt.s32.totalorder %s1248_s5, %s1248_s5 }
 0xe7b   :  { %p1255_p11 = por %p1254_p10, %p1253_p9 }
 0xe7d   :  { %p1256_p12 = pnand %p1255_p11, %p1249_p8 }
 0xe80   :  { %v1225_v21 = vpop.eup %1224 }
 0xe81   :  { %v910_v23 = vmul.f32 %v1225_v21, %v906_v22 }
 0xe83   :  { %912 = vst.msk [vmem:[%s1466_s4 + $0x8] sm:$0xff] %vm122_vm3, %v910_v23 }
 0xe84   :  { %915 = vst.msk [vmem:[#allocation6 - $0x6] sm:$0xc0] %vm914_vm4, %v910_v23 }
 0xe85   :  { %1259 = shalt.err (!%p1256_p12)
}
 0xe86   :  { %s1260_s8 = scalar_lea.hbm %s1468_s6, 32 }
 0xe87   :  { %p1261_p13 = scmp.ne.s32.totalorder %s1468_s6, %s1260_s8  ;;  %p1264_p0 = scmp.lt.u32.totalorder %s1260_s8, %s1468_s6 }
 0xe89   :  { %p1266_p1 = pnand %p1264_p0, %p1261_p13 }
 0xe8b   :  { %1269 = shalt.err (!%p1266_p1)
}
 0xe8c   :  { %937 = dma.vmem_to_hbm [thread:$0]  %s935_s28, 32, %s1468_s6, [#allocation7]  }
 0xe8d   :  { %1270 = dma.done.wait [#allocation5], 32  }
 0xe8e   :  { %1271 = vsyncadd [#allocation5], 4294967264 }
 0xe8f   :  { %1272 = dma.done.wait [#allocation7], 32  }
 0xe90   :  { %1273 = vsyncadd [#allocation7], 4294967264 }
 0xe91   :  { %946 = vsyncpa [#allocation5], 1 }
 0xe92   :  { %947 = vsyncpa [#allocation7], 1 }

</bundles_post_ra>
